<compile_context>
chip_gen: v7x
topology: tpu7x:2x2x1
jax: 0.10.0
libtpu: 0.0.40
codegen_flags: <defaults>
</compile_context>

<pallas_src>
import math
from functools import partial

import jax
import jax.numpy as jnp
from jax import lax
from jax.experimental import pallas as pl
from jax.experimental.pallas import tpu as pltpu


def _vmem_limit_bytes():
    """Per-generation scoped-VMEM cap: ~half of physical VMEM."""
    try:
        info = pltpu.get_tpu_info()
        cap = int(getattr(info, "vmem_capacity_bytes", 0)) or 128 * 1024 * 1024
    except Exception:  # conservative fallback
        cap = 128 * 1024 * 1024
    # ~32 MiB on v7x (64 MiB physical), ~64 MiB on v5e/v6e (128 MiB physical):
    # leaves headroom for double-buffered BlockSpec inputs + compiler scratch.
    return max(32 * 1024 * 1024, min(cap // 2, 96 * 1024 * 1024))


_VMEM_LIMIT = _vmem_limit_bytes()


def _pick_tile(dim, target, multiple=8):
    """Largest divisor of `dim` <= `target`, preferring lane/sublane-aligned
    sizes; never silently falls back to the full extent for large dims.
    TODO(synk): pad ragged dims to a friendly multiple instead of shrinking."""
    if dim <= target:
        return dim
    best_any, best_aligned = 1, 0
    for t in range(1, target + 1):
        if dim % t == 0:
            best_any = t
            if t % multiple == 0:
                best_aligned = t
    return best_aligned or best_any


# ----------------------------- tiled matmul --------------------------------

def _matmul_kernel(x_ref, w_ref, o_ref, acc_ref):
    @pl.when(pl.program_id(2) == 0)
    def _init():
        acc_ref[...] = jnp.zeros_like(acc_ref)

    acc_ref[...] += jnp.dot(
        x_ref[...], w_ref[...], preferred_element_type=jnp.float32)

    @pl.when(pl.program_id(2) == pl.num_programs(2) - 1)
    def _store():
        o_ref[...] = acc_ref[...].astype(o_ref.dtype)


def matmul(x, w, *, tm=512, tn=512, tk=1024, out_dtype=None):
    """y = x @ w, tiled (M, N, K) with an f32 VMEM accumulator.

    Defaults target bf16 operands on v6e/v7x (tile VMEM ~6 MiB incl. double
    buffering).  On v5e prefer tn=128..256 and deeper pipelining over larger
    tiles.  TODO(synk): int8 weights on v5e/v6e, fp8 on v7x (no integer MXU
    path there) for a further ~2x on decode-shaped GEMVs.
    """
    M, K = x.shape
    K2, N = w.shape
    assert K == K2
    out_dtype = out_dtype or x.dtype
    tm = _pick_tile(M, tm, multiple=8)
    tn = _pick_tile(N, tn, multiple=128)
    tk = _pick_tile(K, tk, multiple=128)
    return pl.pallas_call(
        _matmul_kernel,
        out_shape=jax.ShapeDtypeStruct((M, N), out_dtype),
        grid=(M // tm, N // tn, K // tk),
        in_specs=[
            pl.BlockSpec((tm, tk), lambda i, j, k: (i, k)),
            pl.BlockSpec((tk, tn), lambda i, j, k: (k, j)),
        ],
        out_specs=pl.BlockSpec((tm, tn), lambda i, j, k: (i, j)),
        scratch_shapes=[pltpu.VMEM((tm, tn), jnp.float32)],
        compiler_params=pltpu.CompilerParams(
            dimension_semantics=("parallel", "parallel", "arbitrary"),
            vmem_limit_bytes=_VMEM_LIMIT,
        ),
    )(x, w)


# --------------------- fused QKV split + RoPE kernel ------------------------

def _split_rope_kernel(qkv_ref, cos_ref, sin_ref, q_ref, k_ref, v_ref, *,
                       num_heads, num_kv_groups):
    H, KVG = num_heads, num_kv_groups
    x = qkv_ref[0]                                       # (tS, H + 2*KVG, D)
    D = x.shape[-1]
    cos = cos_ref[0][:, None, :].astype(jnp.float32)     # (tS, 1, D)
    sin = sin_ref[0][:, None, :].astype(jnp.float32)

    def rope(t):                                         # t: (tS, n, D)
        tf = t.astype(jnp.float32)
        if D % 128 == 0:
            # lane-aligned head_dim: rotate_half = XLU roll + a +/-1 sign vec
            sign = jnp.where(
                lax.broadcasted_iota(jnp.int32, (1, 1, D), 2) < D // 2,
                -1.0, 1.0)
            rot = pltpu.roll(tf, shift=D // 2, axis=-1) * sign
        else:
            # tiny / unaligned head_dim (tests): slice + concat fallback
            t1 = tf[..., : D // 2]
            t2 = tf[..., D // 2:]
            rot = jnp.concatenate([-t2, t1], axis=-1)
        return tf * cos + rot * sin

    q = rope(x[:, :H, :])                                # (tS, H, D) f32
    k = rope(x[:, H:H + KVG, :])                         # (tS, KVG, D) f32
    v = x[:, H + KVG:, :]                                # (tS, KVG, D)

    q_ref[0] = q.astype(q_ref.dtype)
    # Per-group stores fold the (B, S, KVG, D) -> (B, KVG, S, D) cache-layout
    # transpose into this kernel (no wrapper-side HBM relayout).
    for g in range(KVG):
        k_ref[0, g] = k[:, g, :].astype(k_ref.dtype)
        v_ref[0, g] = v[:, g, :].astype(v_ref.dtype)


def split_rope(qkv, cos, sin, *, num_heads, num_kv_groups, seq_tile=256):
    """Split fused QKV, apply RoPE to q/k, emit k/v in KV-cache layout.

    qkv: (B, S, H + 2*KVG, D) bf16; cos/sin: (B, S, D) f32.
    Returns q (B, S, H, D), roped k (B, KVG, S, D), v (B, KVG, S, D).
    """
    B, S, NHT, D = qkv.shape
    H, KVG = num_heads, num_kv_groups
    tS = _pick_tile(S, seq_tile, multiple=8)
    return pl.pallas_call(
        partial(_split_rope_kernel, num_heads=H, num_kv_groups=KVG),
        out_shape=(
            jax.ShapeDtypeStruct((B, S, H, D), qkv.dtype),
            jax.ShapeDtypeStruct((B, KVG, S, D), qkv.dtype),
            jax.ShapeDtypeStruct((B, KVG, S, D), qkv.dtype),
        ),
        grid=(B, S // tS),
        in_specs=[
            pl.BlockSpec((1, tS, NHT, D), lambda b, i: (b, i, 0, 0)),
            pl.BlockSpec((1, tS, D), lambda b, i: (b, i, 0)),
            pl.BlockSpec((1, tS, D), lambda b, i: (b, i, 0)),
        ],
        out_specs=(
            pl.BlockSpec((1, tS, H, D), lambda b, i: (b, i, 0, 0)),
            pl.BlockSpec((1, KVG, tS, D), lambda b, i: (b, 0, i, 0)),
            pl.BlockSpec((1, KVG, tS, D), lambda b, i: (b, 0, i, 0)),
        ),
        compiler_params=pltpu.CompilerParams(
            dimension_semantics=("parallel", "parallel"),
            vmem_limit_bytes=_VMEM_LIMIT,
        ),
    )(qkv, cos, sin)


# ------------------------- GQA flash attention ------------------------------

# Large finite (not -inf): self-correcting with the online softmax even if a
# row's first visible KV tile were fully masked.
_MASK_VALUE = -1e30


def _attention_kernel(q_ref, k_ref, v_ref, o_ref,
                      m_sc, l_sc, acc_sc, qflat_sc, *,
                      scale, start_pos, causal, tq, tkv, group_size):
    qi = pl.program_id(2)
    t = pl.program_id(3)
    G = group_size

    @pl.when(t == 0)
    def _init():
        m_sc[...] = jnp.full(m_sc.shape, -jnp.inf, m_sc.dtype)
        l_sc[...] = jnp.zeros(l_sc.shape, l_sc.dtype)
        acc_sc[...] = jnp.zeros(acc_sc.shape, acc_sc.dtype)
        # Flatten the (tq, G, D) query block once per output tile (head-major
        # rows g*tq + s) so every KV step is ONE MXU matmul with M = G*tq.
        qv = q_ref[...]                                  # (tq, G, D)
        for g in range(G):
            qflat_sc[g * tq:(g + 1) * tq, :] = qv[:, g, :]

    def _step():
        k = k_ref[0, 0]                                  # (tkv, D)
        v = v_ref[0, 0]
        rows = G * tq

        # scores = q @ k^T via dimension_numbers (no explicit transpose).
        s = lax.dot_general(
            qflat_sc[...], k, (((1,), (1,)), ((), ())),
            preferred_element_type=jnp.float32) * scale  # (rows, tkv)

        if causal:
            # In-kernel causal mask: no dense HBM mask, no group concatenate.
            s_local = lax.broadcasted_iota(jnp.int32, (rows, tkv), 0) % tq
            q_pos = start_pos + qi * tq + s_local
            k_pos = t * tkv + lax.broadcasted_iota(jnp.int32, (rows, tkv), 1)
            s = jnp.where(k_pos <= q_pos, s, _MASK_VALUE)

        # Online (flash-style) softmax across KV tiles.
        m_prev = m_sc[...]
        m_new = jnp.maximum(m_prev, jnp.max(s, axis=-1, keepdims=True))
        alpha = jnp.exp(m_prev - m_new)
        p = jnp.exp(s - m_new)
        l_sc[...] = alpha * l_sc[...] + jnp.sum(p, axis=-1, keepdims=True)
        acc_sc[...] = alpha * acc_sc[...] + lax.dot_general(
            p.astype(v.dtype), v, (((1,), (0,)), ((), ())),
            preferred_element_type=jnp.float32)
        m_sc[...] = m_new

    if causal:
        # Skip KV tiles that lie entirely above the causal diagonal.
        pl.when(t * tkv <= start_pos + qi * tq + (tq - 1))(_step)
    else:
        _step()

    @pl.when(t == pl.num_programs(3) - 1)
    def _finalize():
        inv_l = pl.reciprocal(l_sc[...], approx=True)    # EUP slot
        out = acc_sc[...] * inv_l                        # (G*tq, D) f32
        out3d = jnp.stack(
            [out[g * tq:(g + 1) * tq, :] for g in range(G)], axis=1)
        o_ref[...] = out3d.astype(o_ref.dtype)           # (tq, G, D) final layout


def attention(q, keys, values, *, start_pos, causal, q_tile=256, kv_tile=1024):
    """GQA flash attention.

    q:            (B, S, KVG, G, D)  (pure view of the projection output)
    keys/values:  (B, KVG, KV, D)    (KV-cache layout)
    Returns (B, S, KVG, G, D); reshaping to (B*S, E) is a free view.

    TODO(synk): fixed padded KV length + kv_len via scalar prefetch (SMEM) to
    avoid a recompile per decode step; pipeline_mode=pl.Buffered(3) on the K/V
    specs once KV tiles are large.
    """
    B, S, KVG, G, D = q.shape
    KV = keys.shape[2]
    tq = _pick_tile(S, q_tile, multiple=8)
    tkv = _pick_tile(KV, kv_tile, multiple=128)
    scale = 1.0 / math.sqrt(D)
    return pl.pallas_call(
        partial(_attention_kernel, scale=scale, start_pos=start_pos,
                causal=causal, tq=tq, tkv=tkv, group_size=G),
        out_shape=jax.ShapeDtypeStruct((B, S, KVG, G, D), q.dtype),
        grid=(B, KVG, S // tq, KV // tkv),
        in_specs=[
            pl.BlockSpec((None, tq, None, G, D),
                         lambda b, g, i, t: (b, i, g, 0, 0)),
            pl.BlockSpec((1, 1, tkv, D), lambda b, g, i, t: (b, g, t, 0)),
            pl.BlockSpec((1, 1, tkv, D), lambda b, g, i, t: (b, g, t, 0)),
        ],
        out_specs=pl.BlockSpec((None, tq, None, G, D),
                               lambda b, g, i, t: (b, i, g, 0, 0)),
        scratch_shapes=[
            pltpu.VMEM((G * tq, 1), jnp.float32),    # running max
            pltpu.VMEM((G * tq, 1), jnp.float32),    # running denominator
            pltpu.VMEM((G * tq, D), jnp.float32),    # output accumulator
            pltpu.VMEM((G * tq, D), q.dtype),        # flattened query block
        ],
        compiler_params=pltpu.CompilerParams(
            dimension_semantics=("parallel", "parallel", "parallel",
                                 "arbitrary"),
            vmem_limit_bytes=_VMEM_LIMIT,
        ),
    )(q, keys, values)


# --------------------------- module-level wrapper ----------------------------

class LlamaAttentionPallas:
    """Pallas-TPU port of the PyTorch LlamaAttention forward pass.

    Kernel-side weights/activations are bf16; all MXU matmuls accumulate f32.
    """

    compute_dtype = jnp.bfloat16

    def __init__(self, *, batch_size, embed_dim, num_heads, num_kv_groups,
                 context_length, key):
        self.num_heads = num_heads
        self.num_kv_groups = num_kv_groups
        self.embed_dim = embed_dim
        self.head_dim = embed_dim // num_heads
        self.group_size = num_heads // num_kv_groups
        kv_dim = num_kv_groups * self.head_dim
        cdt = self.compute_dtype

        kq, kk, kv, ko = jax.random.split(key, 4)
        s = 1.0 / math.sqrt(embed_dim)
        # nn.Linear weights are (out_features, in_features); y = x @ W.T
        self.q_w = jax.random.normal(kq, (embed_dim, embed_dim), jnp.float32) * s
        self.k_w = jax.random.normal(kk, (kv_dim, embed_dim), jnp.float32) * s
        self.v_w = jax.random.normal(kv, (kv_dim, embed_dim), jnp.float32) * s
        self.o_w = jax.random.normal(ko, (embed_dim, embed_dim), jnp.float32) * s

        # Pre-transposed + fused bf16 kernel-side weights (built once at init).
        # TODO(synk): int8 weights on v5e/v6e or fp8 on v7x for another ~2x.
        self.wqkv_t = jnp.concatenate(
            [self.q_w.T, self.k_w.T, self.v_w.T], axis=1).astype(cdt)
        self.o_w_t = self.o_w.T.astype(cdt)

        # bf16 KV cache in (B, KVG, CTX, D) layout, functionally updated.
        # TODO(synk): replace with an aliased in-place Pallas cache-update
        # kernel (input_output_aliases) + fixed padded KV length so decode does
        # not copy the cache or recompile per token.
        self.cache_k = jnp.zeros(
            (batch_size, num_kv_groups, context_length, self.head_dim), cdt)
        self.cache_v = jnp.zeros_like(self.cache_k)

    def __call__(self, x, pos_emb, mask, start_pos=0):
        B, S, E = x.shape
        H, KVG, G, D = (self.num_heads, self.num_kv_groups,
                        self.group_size, self.head_dim)
        cos, sin = pos_emb
        cdt = self.compute_dtype

        # ---- fused Q/K/V projection: one tiled bf16 matmul -----------------
        qkv = matmul(x.reshape(B * S, E).astype(cdt), self.wqkv_t,
                     out_dtype=cdt)
        qkv = qkv.reshape(B, S, H + 2 * KVG, D)

        # ---- split heads + RoPE + cache-layout K/V in one fused pass --------
        q, k_new, v_new = split_rope(
            qkv, cos.astype(jnp.float32), sin.astype(jnp.float32),
            num_heads=H, num_kv_groups=KVG)

        # ---- KV cache update (functional glue; start_pos static Python int) -
        self.cache_k = lax.dynamic_update_slice(
            self.cache_k, k_new, (0, 0, start_pos, 0))
        self.cache_v = lax.dynamic_update_slice(
            self.cache_v, v_new, (0, 0, start_pos, 0))
        kv_len = start_pos + S
        keys = self.cache_k[:B, :, :kv_len]
        values = self.cache_v[:B, :, :kv_len]

        # ---- GQA flash attention --------------------------------------------
        # TODO(synk): a non-None mask is treated as the standard causal mask
        # (generated in-kernel from start_pos); arbitrary dense additive masks
        # would need an HBM-streamed mask path (broadcast over the group).
        q5 = q.reshape(B, S, KVG, G, D)          # pure view: head = kvg*G + g
        attn = attention(q5, keys, values, start_pos=start_pos,
                         causal=(mask is not None))

        # (B, S, KVG, G, D) -> (B*S, E) is a free view (kernel wrote the final
        # layout), so the o-projection input is lane-dense with no relayout.
        out = matmul(attn.reshape(B * S, E), self.o_w_t, out_dtype=jnp.float32)
        return out.reshape(B, S, E)


# ---------------------------- pure-JAX reference -----------------------------

def reference_forward(m, x, pos_emb, mask, start_pos=0):
    """Pure-JAX reference mirroring the kernel's bf16-weight / f32-accum math."""
    B, S, E = x.shape
    H, KVG, D, G = m.num_heads, m.num_kv_groups, m.head_dim, m.group_size
    cos, sin = pos_emb
    cdt = m.compute_dtype

    def mm(a, w):   # y = a @ w.T, bf16 operands, f32 accumulation
        return jnp.dot(a.astype(cdt), w.T.astype(cdt),
                       preferred_element_type=jnp.float32)

    q = mm(x, m.q_w).astype(cdt).reshape(B, S, H, D).transpose(0, 2, 1, 3)
    k = mm(x, m.k_w).astype(cdt).reshape(B, S, KVG, D).transpose(0, 2, 1, 3)
    v = mm(x, m.v_w).astype(cdt).reshape(B, S, KVG, D).transpose(0, 2, 1, 3)

    def rope(t):
        c = cos[:, None].astype(jnp.float32)
        s_ = sin[:, None].astype(jnp.float32)
        tf = t.astype(jnp.float32)
        t1, t2 = tf[..., : D // 2], tf[..., D // 2:]
        return (tf * c + jnp.concatenate([-t2, t1], axis=-1) * s_).astype(cdt)

    q, k = rope(q), rope(k)
    k = jnp.repeat(k, G, axis=1)
    v = jnp.repeat(v, G, axis=1)

    s = jnp.einsum("bhqd,bhkd->bhqk", q, k,
                   preferred_element_type=jnp.float32) / math.sqrt(D)
    if mask is not None:
        s = s + mask
    mx = jnp.max(s, axis=-1, keepdims=True)
    p = jnp.exp(s - mx)
    l = jnp.sum(p, axis=-1, keepdims=True)
    ctx = jnp.einsum("bhqk,bhkd->bhqd", p.astype(cdt), v,
                     preferred_element_type=jnp.float32) / l
    ctx = ctx.astype(cdt).transpose(0, 2, 1, 3).reshape(B, S, E)
    return mm(ctx, m.o_w)


# ----------------------------------- main ------------------------------------

if __name__ == "__main__":
    # small config consistent with the module
    B, S, E = 2, 8, 32
    NUM_HEADS, NUM_KV_GROUPS = 4, 2
    CONTEXT_LEN = 16
    D = E // NUM_HEADS
    THETA = 500000.0

    key = jax.random.PRNGKey(0)
    k_x, k_w = jax.random.split(key)
    x = jax.random.normal(k_x, (B, S, E), jnp.float32)

    # rotary position embeddings (cos, sin): (B, S, head_dim)
    inv_freq = 1.0 / (THETA ** (jnp.arange(0, D, 2, dtype=jnp.float32) / D))
    pos = jnp.arange(S, dtype=jnp.float32)
    freqs = pos[:, None] * inv_freq[None, :]                  # (S, D/2)
    emb = jnp.concatenate([freqs, freqs], axis=-1)            # (S, D)
    cos = jnp.broadcast_to(jnp.cos(emb)[None], (B, S, D))
    sin = jnp.broadcast_to(jnp.sin(emb)[None], (B, S, D))

    # additive causal mask (start_pos = 0 -> kv_len == seq_len)
    mask = jnp.where(
        jnp.arange(S)[None, :] > jnp.arange(S)[:, None], -1e9, 0.0
    ).astype(jnp.float32)

    attn = LlamaAttentionPallas(
        batch_size=B, embed_dim=E, num_heads=NUM_HEADS,
        num_kv_groups=NUM_KV_GROUPS, context_length=CONTEXT_LEN, key=k_w)

    out = attn(x, (cos, sin), mask, start_pos=0)
    out = jax.block_until_ready(out)

    ref = reference_forward(attn, x, (cos, sin), mask, start_pos=0)
    assert out.shape == (B, S, E)
    err = jnp.max(jnp.abs(out - ref))
    assert jnp.allclose(out, ref, rtol=1e-2, atol=1e-2), f"max abs err {err}"

    print("KERNEL_OK")
</pallas_src>

<mosaic_0001>
module attributes {stable_mosaic.version = 11 : i64} {
  func.func @_matmul_kernel(%arg0: i32, %arg1: i32, %arg2: i32, %arg3: memref<16x32xbf16, #tpu.memory_space<vmem>>, %arg4: memref<32x64xbf16, #tpu.memory_space<vmem>>, %arg5: memref<16x64xbf16, #tpu.memory_space<vmem>>, %arg6: memref<16x64xf32, #tpu.memory_space<vmem>>) attributes {dimension_semantics = [#tpu.dimension_semantics<parallel>, #tpu.dimension_semantics<parallel>, #tpu.dimension_semantics<arbitrary>], iteration_bounds = array<i64: 1, 1, 1>, scalar_prefetch = 0 : i64, scratch_operands = 1 : i64, tpu.core_type = #tpu.core_type<tc>, window_params = [{transform_indices = @transform_0, window_bounds = array<i64: 16, 32>}, {transform_indices = @transform_1, window_bounds = array<i64: 32, 64>}, {transform_indices = @transform_2, window_bounds = array<i64: 16, 64>}]} {
    %c0_i32 = arith.constant 0 : i32
    %0 = arith.cmpi eq, %arg2, %c0_i32 : i32
    %1 = arith.extui %0 : i1 to i32
    %c0_i32_0 = arith.constant 0 : i32
    %2 = arith.cmpi ne, %1, %c0_i32_0 : i32
    scf.if %2 {
      %cst_10 = arith.constant 0.000000e+00 : f32
      %12 = vector.broadcast %cst_10 : f32 to vector<16x64xf32>
      %c0_11 = arith.constant 0 : index
      %c0_12 = arith.constant 0 : index
      %13 = vector.load %arg6[%c0_11, %c0_12] : memref<16x64xf32, #tpu.memory_space<vmem>>, vector<16x64xf32>
      tpu.vector_store %arg6[%c0_11, %c0_12], %12 {strides = array<i32>} : memref<16x64xf32, #tpu.memory_space<vmem>>, vector<16x64xf32>,
    } else {
    }
    %c0 = arith.constant 0 : index
    %c0_1 = arith.constant 0 : index
    %3 = vector.load %arg6[%c0, %c0_1] : memref<16x64xf32, #tpu.memory_space<vmem>>, vector<16x64xf32>
    %c0_2 = arith.constant 0 : index
    %c0_3 = arith.constant 0 : index
    %4 = vector.load %arg3[%c0_2, %c0_3] : memref<16x32xbf16, #tpu.memory_space<vmem>>, vector<16x32xbf16>
    %c0_4 = arith.constant 0 : index
    %c0_5 = arith.constant 0 : index
    %5 = vector.load %arg4[%c0_4, %c0_5] : memref<32x64xbf16, #tpu.memory_space<vmem>>, vector<32x64xbf16>
    %cst = arith.constant dense<0.000000e+00> : vector<16x64xf32>
    %6 = tpu.matmul %4, %5, %cst {dimension_numbers = #tpu.dot_dimension_numbers<[1], [0], [0], [1], [0, 0, 1, 1], [], []>} : vector<16x32xbf16>, vector<32x64xbf16>, vector<16x64xf32> -> vector<16x64xf32>
    %7 = arith.addf %3, %6 : vector<16x64xf32>
    %c0_6 = arith.constant 0 : index
    %c0_7 = arith.constant 0 : index
    %8 = vector.load %arg6[%c0_6, %c0_7] : memref<16x64xf32, #tpu.memory_space<vmem>>, vector<16x64xf32>
    tpu.vector_store %arg6[%c0_6, %c0_7], %7 {strides = array<i32>} : memref<16x64xf32, #tpu.memory_space<vmem>>, vector<16x64xf32>,
    %c0_i32_8 = arith.constant 0 : i32
    %9 = arith.cmpi eq, %arg2, %c0_i32_8 : i32
    %10 = arith.extui %9 : i1 to i32
    %c0_i32_9 = arith.constant 0 : i32
    %11 = arith.cmpi ne, %10, %c0_i32_9 : i32
    scf.if %11 {
      %c0_10 = arith.constant 0 : index
      %c0_11 = arith.constant 0 : index
      %12 = vector.load %arg6[%c0_10, %c0_11] : memref<16x64xf32, #tpu.memory_space<vmem>>, vector<16x64xf32>
      %13 = arith.truncf %12 : vector<16x64xf32> to vector<16x64xbf16>
      %c0_12 = arith.constant 0 : index
      %c0_13 = arith.constant 0 : index
      %14 = vector.load %arg5[%c0_12, %c0_13] : memref<16x64xbf16, #tpu.memory_space<vmem>>, vector<16x64xbf16>
      tpu.vector_store %arg5[%c0_12, %c0_13], %13 {strides = array<i32>} : memref<16x64xbf16, #tpu.memory_space<vmem>>, vector<16x64xbf16>,
    } else {
    }
    return
  }
  func.func @transform_0(%arg0: i32, %arg1: i32, %arg2: i32) -> (i32, i32) {
    %c0_i32 = arith.constant 0 : i32
    return %arg0, %arg2 : i32, i32
  }
  func.func @transform_1(%arg0: i32, %arg1: i32, %arg2: i32) -> (i32, i32) {
    %c0_i32 = arith.constant 0 : i32
    return %arg2, %arg1 : i32, i32
  }
  func.func @transform_2(%arg0: i32, %arg1: i32, %arg2: i32) -> (i32, i32) {
    %c0_i32 = arith.constant 0 : i32
    return %arg0, %arg1 : i32, i32
  }
}

</mosaic_0001>

<bundles_post_ra>
// kernel: tpu_custom_call.1
= control target key start
LH: loop header
LB: loop body
LE: loop exit
PB: predicated region body
PF: predicated region fallthrough
CT: control target
= control target key end

     0   :  { %7 = vsyncpa [#allocation4], 0  ;;  %s329_s0 = inlined_call_operand.hbm [shape: bf16[16,32], index: 0, kind: input, shape index: {}]   ;;  %s330_s1 = inlined_call_operand.hbm [shape: bf16[32,64], index: 1, kind: input, shape index: {}]   ;;  %s331_s2 = inlined_call_operand.hbm [shape: bf16[16,64], index: 2, kind: output, shape index: {}]  }
   0x1   :  { %8 = vsyncpa [#allocation7], 0 }
   0x2   :  { %9 = vsyncpa [#allocation5], 0  ;;  %s258_s9 = smov [#allocation3]   ;;  %s186_s13 = scalar_lea.hbm %s329_s0, 128 }
   0x3   :  { %s15_s10 = sshll.u32 %s258_s9, 4  ;;  %p187_p0 = scmp.ne.s32.totalorder %s329_s0, %s186_s13  ;;  %s16_s10 = int_to_ptr.vmem [resolvable:$true] %s15_s10 }
   0x4   :  { %p190_p1 = scmp.lt.u32.totalorder %s186_s13, %s329_s0 }
   0x6   :  { %p192_p2 = pnand %p190_p1, %p187_p0 }
   0x8   :  { %195 = shalt.err (!%p192_p2)
}
   0x9   :  { %s196_s18 = scalar_lea.vmem %s16_s10, 128  ;;  %p201_p4 = scmp.lt.s32.totalorder %s16_s10, %s16_s10 }
   0xa   :  { %p197_p3 = scmp.ne.s32.totalorder %s16_s10, %s196_s18  ;;  %p202_p5 = scmp.lt.s32.totalorder %s196_s18, %s196_s18 }
   0xc   :  { %p203_p6 = por %p202_p5, %p201_p4 }
   0xe   :  { %p204_p7 = pnand %p203_p6, %p197_p3 }
  0x10   :  { %207 = shalt.err (!%p204_p7)
}
  0x11   :  { %s259_s19 = smov 64   ;;  %s260_s20 = smov 4  }
  0x12   :  { %21 = dma.hbm_to_vmem [thread:$0]  %s329_s0, 128, %s16_s10, [#allocation4], %s259_s19, %s259_s19, %s260_s20  }
  0x13   :  { %s261_s23 = smov [#allocation6]   ;;  %s208_s27 = scalar_lea.hbm %s330_s1, 256 }
  0x14   :  { %s27_s24 = sshll.u32 %s261_s23, 4  ;;  %p209_p8 = scmp.ne.s32.totalorder %s330_s1, %s208_s27  ;;  %s28_s24 = int_to_ptr.vmem [resolvable:$true] %s27_s24 }
  0x15   :  { %p212_p9 = scmp.lt.u32.totalorder %s208_s27, %s330_s1 }
  0x17   :  { %p214_p10 = pnand %p212_p9, %p209_p8 }
  0x19   :  { %217 = shalt.err (!%p214_p10)
}
  0x1a   :  { %s218_s4 = scalar_lea.vmem %s28_s24, 256  ;;  %p223_p12 = scmp.lt.s32.totalorder %s28_s24, %s28_s24 }
  0x1b   :  { %p219_p11 = scmp.ne.s32.totalorder %s28_s24, %s218_s4  ;;  %p224_p13 = scmp.lt.s32.totalorder %s218_s4, %s218_s4 }
  0x1d   :  { %p225_p0 = por %p224_p13, %p223_p12 }
  0x1f   :  { %p226_p1 = pnand %p225_p0, %p219_p11 }
  0x21   :  { %229 = shalt.err (!%p226_p1)
}
  0x22   :  { %33 = dma.hbm_to_vmem [thread:$0]  %s330_s1, 256, %s28_s24, [#allocation7], %s259_s19, %s259_s19, %s260_s20  }
  0x23   :  { %252 = dma.done.wait [#allocation4], 128  }
  0x24   :  { %253 = vsyncadd [#allocation4], 4294967168 }
  0x25   :  { %254 = dma.done.wait [#allocation7], 256  }
  0x26   :  { %255 = vsyncadd [#allocation7], 4294967040  ;;  %vm45_vm0 = vcmask 523264   ;;  %v262_v0 = vmov 0.0   ;;  %vm263_vm1 = vmmov 0   ;;  %v183_v1 = vld [vmem:[#allocation6] sm:$0xff]  }
  0x27   :  { %46 = vst.msk [vmem:[#allocation2] sm:$0xff] %vm45_vm0, %v262_v0  ;;  %47 = vst.msk [vmem:[#allocation2 + $0x8] sm:$0xff] %vm45_vm0, %v262_v0  ;;  %168 = vmatprep.subr.bf16.mxu0 %v262_v0  ;;  %172 = vmatprep.mubr.msk.bf16.mxu0 %vm263_vm1, %v262_v0  ;;  %v184_v2 = vld [vmem:[#allocation6 + $0x8] sm:$0xff]   ;;  %v185_v3 = vld [vmem:[#allocation3] sm:$0xff]   ;;  %vm73_vm2 = vcmask 261120   ;;  %vm136_vm3 = vcmask 519168  }
  0x28   :  { %169 = vmatpush3.bf16.msra.mxu0 %v183_v1  ;;  %s264_s1 = smov [#allocation8]  }
  0x29   :  { %170 = vmatprep.subr.bf16.mxu0 %v262_v0  ;;  %s144_s6 = sshll.u32 %s264_s1, 4  ;;  %s145_s6 = int_to_ptr.vmem [resolvable:$true] %s144_s6 }
  0x2a   :  { %s230_s7 = scalar_lea.vmem %s145_s6, 128  ;;  %p235_p3 = scmp.lt.s32.totalorder %s145_s6, %s145_s6 }
  0x2b   :  { %p231_p2 = scmp.ne.s32.totalorder %s145_s6, %s230_s7  ;;  %p236_p4 = scmp.lt.s32.totalorder %s230_s7, %s230_s7 }
  0x2c   :  { %171 = vmatpush3.bf16.msra.mxu0 %v184_v2 }
  0x2d   :  { %p237_p5 = por %p236_p4, %p235_p3 }
  0x2e   :  { %v48_v4 = vld [vmem:[#allocation2] sm:$0xff]  ;;  %v49_v6 = vld [vmem:[#allocation2 + $0x8] sm:$0xff] }
  0x2f   :  { %173 = vmatmul.mubr.msk.bf16.vlgmr.msra.gmra.mrb[0].mxu0 %vm73_vm2, %v185_v3  ;;  %p238_p6 = pnand %p237_p5, %p231_p2 }
 0x102   :  { %v111_v5 = vpop.f32.mrb[0].mxu0 }
 0x103   :  { %v118_v7 = vadd.f32 %v111_v5, %v48_v4  ;;  %v174_v8 = vpop.f32.mrb[1].mxu0 }
 0x104   :  { %v114_v9 = vpop.f32.mrb[2].mxu0 }
 0x105   :  { %121 = vst.msk [vmem:[#allocation2] sm:$0xff] %vm45_vm0, %v118_v7  ;;  %v119_v10 = vadd.f32 %v114_v9, %v49_v6  ;;  %v175_v11 = vpop.f32.mrb[3].mxu0 }
 0x107   :  { %122 = vst.msk [vmem:[#allocation2 + $0x8] sm:$0xff] %vm45_vm0, %v119_v10 }
 0x10c   :  { %v126_v12 = vld [vmem:[#allocation2] sm:$0xff] }
 0x10d   :  { %v163_v13 = vpack.c.bf16 %v126_v12, %v126_v12 }
 0x10e   :  { %v127_v14 = vld [vmem:[#allocation2 + $0x8] sm:$0xff] }
 0x10f   :  { %v164_v15 = vpack.c.bf16 %v127_v14, %v127_v14  ;;  %137 = vst.msk [vmem:[#allocation8] sm:$0xf] %vm136_vm3, %v163_v13 }
 0x111   :  { %138 = vst.msk [vmem:[#allocation8 + $0x4] sm:$0xf] %vm136_vm3, %v164_v15 }
 0x112   :  { %241 = shalt.err (!%p238_p6)
}
 0x113   :  { %s242_s10 = scalar_lea.hbm %s331_s2, 128 }
 0x114   :  { %p243_p7 = scmp.ne.s32.totalorder %s331_s2, %s242_s10  ;;  %p246_p8 = scmp.lt.u32.totalorder %s242_s10, %s331_s2 }
 0x116   :  { %p248_p9 = pnand %p246_p8, %p243_p7 }
 0x118   :  { %251 = shalt.err (!%p248_p9)
}
 0x119   :  { %150 = dma.vmem_to_hbm [thread:$0]  %s145_s6, 128, %s331_s2, [#allocation5], %s259_s19, %s259_s19, %s260_s20  }
 0x11a   :  { %256 = dma.done.wait [#allocation5], 128  }
 0x11b   :  { %257 = vsyncadd [#allocation5], 4294967168 }
 0x11c   :  { %154 = vsyncpa [#allocation4], 1 }
 0x11d   :  { %155 = vsyncpa [#allocation7], 1 }
 0x11e   :  { %156 = vsyncpa [#allocation5], 1 }

</bundles_post_ra>
